<compile_context>
chip_gen: v7x
topology: tpu7x:2x2x1
jax: 0.10.0
libtpu: 0.0.40
codegen_flags: <defaults>
</compile_context>

<pallas_src>
import jax
import jax.numpy as jnp
from jax.experimental import pallas as pl
from jax.experimental.pallas import tpu as pltpu

_LANE = 128
_EPS = 1e-7  # effective in float32 (1 - 1e-12 rounds to 1.0; 1e-7 does not)


def _cdiv(a, b):
    return -(-a // b)


def _rup8(n):
    return _cdiv(n, 8) * 8


def _make_kernel(tr0, tr1, g_steps, n0, n1):
    """Fused kernel: per-lane partial sums of the two elementwise BCE losses."""

    def kernel(logit_ref, tgt_ref, attn_ref, sup_ref, out_ref,
               acc0_ref, acc1_ref):
        c = pl.program_id(0)          # parallel chunk
        g = pl.program_id(1)          # reduction step within chunk

        @pl.when(g == 0)
        def _():
            acc0_ref[...] = jnp.zeros_like(acc0_ref)
            acc1_ref[...] = jnp.zeros_like(acc1_ref)

        tile_idx = c * g_steps + g    # global row-tile index into each slab

        # ---- sub-loss 0: BCE-with-logits (per-element, summed) ------------
        x = logit_ref[...].astype(jnp.float32)
        t = tgt_ref[...].astype(jnp.float32)
        bce0 = (jnp.maximum(x, 0.0) - x * t
                + jnp.log1p(jnp.exp(-jnp.abs(x))))
        row0 = jax.lax.broadcasted_iota(jnp.int32, (tr0, _LANE), 0)
        lane0 = jax.lax.broadcasted_iota(jnp.int32, (tr0, _LANE), 1)
        idx0 = (tile_idx * tr0 + row0) * _LANE + lane0
        bce0 = jnp.where(idx0 < n0, bce0, 0.0)
        acc0_ref[...] += jnp.sum(bce0, axis=0, keepdims=True)

        # ---- sub-loss 1: attention-supervision weighted BCE ----------------
        p = attn_ref[...].astype(jnp.float32)
        s = sup_ref[...].astype(jnp.float32)
        p_c = jnp.clip(p, _EPS, 1.0 - _EPS)
        bce1 = -s * (s * jnp.log(p_c) + (1.0 - s) * jnp.log1p(-p_c))
        row1 = jax.lax.broadcasted_iota(jnp.int32, (tr1, _LANE), 0)
        lane1 = jax.lax.broadcasted_iota(jnp.int32, (tr1, _LANE), 1)
        idx1 = (tile_idx * tr1 + row1) * _LANE + lane1
        bce1 = jnp.where(idx1 < n1, bce1, 0.0)
        acc1_ref[...] += jnp.sum(bce1, axis=0, keepdims=True)

        # ---- writeback of per-lane partial sums (once per chunk) -----------
        @pl.when(g == g_steps - 1)
        def _():
            out_ref[0:1, :] = acc0_ref[...]
            out_ref[1:2, :] = acc1_ref[...]

    return kernel


def multi_loss(logits, targets, attention, attention_supervision,
               loss_weights=(0.3, 0.7),
               use_uncertainty_weight=False, uncertainty_weight=None,
               num_chunks=2, tile_rows_max=1024):
    """Pallas implementation of MultiLoss.forward for the two configured losses."""
    B, C = logits.shape
    Ba, S = attention.shape
    assert targets.shape == (B, C)
    assert attention_supervision.shape == (Ba, S)

    n0 = B * C
    n1 = Ba * S

    # --- choose tiling: lane-dense slabs, shared (num_chunks, G) grid -------
    r0 = _cdiv(n0, _LANE)
    r1 = _cdiv(n1, _LANE)
    nc = max(1, int(num_chunks))
    r0c = _cdiv(r0, nc)
    r1c = _cdiv(r1, nc)
    g_steps = max(1, _cdiv(max(r0c, r1c), tile_rows_max))
    tr0 = _rup8(max(1, _cdiv(r0c, g_steps)))
    tr1 = _rup8(max(1, _cdiv(r1c, g_steps)))
    rows0 = nc * g_steps * tr0
    rows1 = nc * g_steps * tr1

    def to_slab(a, total_rows):
        flat = a.reshape(-1)
        pad = total_rows * _LANE - flat.shape[0]
        flat = jnp.pad(flat, (0, pad))          # zero pad; masked in-kernel
        return flat.reshape(total_rows, _LANE)  # native dtype preserved

    logits_s = to_slab(logits, rows0)
    targets_s = to_slab(targets, rows0)
    attn_s = to_slab(attention, rows1)
    sup_s = to_slab(attention_supervision, rows1)

    kernel = _make_kernel(tr0, tr1, g_steps, n0, n1)

    bytes_in = sum(int(a.size) * a.dtype.itemsize
                   for a in (logits_s, targets_s, attn_s, sup_s))
    cost = pl.CostEstimate(
        flops=int(7 * (n0 + n1)),
        transcendentals=int(2 * n0 + 2 * n1),
        bytes_accessed=int(bytes_in + 2 * nc * _LANE * 4),
    )

    partials = pl.pallas_call(
        kernel,
        out_shape=jax.ShapeDtypeStruct((2, nc * _LANE), jnp.float32),
        grid_spec=pltpu.PrefetchScalarGridSpec(
            num_scalar_prefetch=0,
            grid=(nc, g_steps),
            in_specs=[
                pl.BlockSpec((tr0, _LANE), lambda c, g: (c * g_steps + g, 0)),
                pl.BlockSpec((tr0, _LANE), lambda c, g: (c * g_steps + g, 0)),
                pl.BlockSpec((tr1, _LANE), lambda c, g: (c * g_steps + g, 0)),
                pl.BlockSpec((tr1, _LANE), lambda c, g: (c * g_steps + g, 0)),
            ],
            out_specs=pl.BlockSpec((2, _LANE), lambda c, g: (0, c)),
            scratch_shapes=[pltpu.VMEM((1, _LANE), jnp.float32),
                            pltpu.VMEM((1, _LANE), jnp.float32)],
        ),
        compiler_params=pltpu.CompilerParams(
            dimension_semantics=("parallel", "arbitrary"),
            vmem_limit_bytes=32 * 1024 * 1024),
        cost_estimate=cost,
    )(logits_s, targets_s, attn_s, sup_s)

    # Tiny final reduction + weighted combine in plain XLA (per review).
    sum0 = jnp.sum(partials[0])
    sum1 = jnp.sum(partials[1])
    loss0 = sum0 / jnp.float32(n0) * jnp.float32(C)   # mean * num_classes
    loss1 = sum1 / jnp.float32(n1) * jnp.float32(S)   # mean * attention length

    if use_uncertainty_weight:
        assert uncertainty_weight is not None
        u = uncertainty_weight.astype(jnp.float32)
        return (jnp.exp(-u[0]) * loss0 + u[0]) + (jnp.exp(-u[1]) * loss1 + u[1])
    return (jnp.float32(loss_weights[0]) * loss0
            + jnp.float32(loss_weights[1]) * loss1)


def _reference_multi_loss(logits, targets, attention, attention_supervision,
                          loss_weights=(0.3, 0.7),
                          use_uncertainty_weight=False, uncertainty_weight=None):
    """Plain-JAX reference (mmf semantics) for correctness checking."""
    x = logits.astype(jnp.float32)
    t = targets.astype(jnp.float32)
    bce0 = jnp.maximum(x, 0.0) - x * t + jnp.log1p(jnp.exp(-jnp.abs(x)))
    l0 = jnp.mean(bce0) * x.shape[1]

    p = jnp.clip(attention.astype(jnp.float32), _EPS, 1.0 - _EPS)
    s = attention_supervision.astype(jnp.float32)
    bce1 = -s * (s * jnp.log(p) + (1.0 - s) * jnp.log1p(-p))
    l1 = jnp.mean(bce1) * attention.shape[1]

    if use_uncertainty_weight:
        u = uncertainty_weight.astype(jnp.float32)
        return (jnp.exp(-u[0]) * l0 + u[0]) + (jnp.exp(-u[1]) * l1 + u[1])
    return loss_weights[0] * l0 + loss_weights[1] * l1


if __name__ == "__main__":
    key = jax.random.PRNGKey(0)
    k1, k2, k3, k4 = jax.random.split(key, 4)

    # --- small shapes consistent with the module config ---------------------
    B, C, S = 2, 32, 8
    logits = jax.random.normal(k1, (B, C), dtype=jnp.float32)
    targets = jax.random.bernoulli(k2, 0.5, (B, C)).astype(jnp.float32)
    attention = jax.nn.sigmoid(jax.random.normal(k3, (B, S), dtype=jnp.float32))
    attention_sup = jax.random.bernoulli(k4, 0.3, (B, S)).astype(jnp.float32)

    # Default path: static config weights (0.3, 0.7).
    loss = multi_loss(logits, targets, attention, attention_sup,
                      loss_weights=(0.3, 0.7))
    loss = jax.block_until_ready(loss)
    ref = _reference_multi_loss(logits, targets, attention, attention_sup,
                                loss_weights=(0.3, 0.7))
    assert jnp.allclose(loss, ref, rtol=1e-5, atol=1e-5), (loss, ref)

    # Uncertainty-weighted path: exp(-u_i)*L_i + u_i (now validated).
    uw = jnp.array([0.1, -0.2], dtype=jnp.float32)
    loss_u = multi_loss(logits, targets, attention, attention_sup,
                        use_uncertainty_weight=True, uncertainty_weight=uw)
    loss_u = jax.block_until_ready(loss_u)
    ref_u = _reference_multi_loss(logits, targets, attention, attention_sup,
                                  use_uncertainty_weight=True,
                                  uncertainty_weight=uw)
    assert jnp.allclose(loss_u, ref_u, rtol=1e-5, atol=1e-5), (loss_u, ref_u)

    # Medium shapes in bf16 (native-dtype path) with a forced multi-step grid,
    # exercising the tiled accumulator + padding masks.
    kb1, kb2, kb3, kb4 = jax.random.split(jax.random.PRNGKey(1), 4)
    Bm, Cm, Sm = 256, 1000, 144
    logits_m = jax.random.normal(kb1, (Bm, Cm), dtype=jnp.float32).astype(jnp.bfloat16)
    targets_m = jax.random.bernoulli(kb2, 0.5, (Bm, Cm)).astype(jnp.bfloat16)
    attn_m = jax.nn.sigmoid(
        jax.random.normal(kb3, (Bm, Sm), dtype=jnp.float32)).astype(jnp.bfloat16)
    sup_m = jax.random.bernoulli(kb4, 0.3, (Bm, Sm)).astype(jnp.bfloat16)

    loss_m = multi_loss(logits_m, targets_m, attn_m, sup_m,
                        loss_weights=(0.3, 0.7), tile_rows_max=256)
    loss_m = jax.block_until_ready(loss_m)
    ref_m = _reference_multi_loss(logits_m, targets_m, attn_m, sup_m,
                                  loss_weights=(0.3, 0.7))
    assert jnp.allclose(loss_m, ref_m, rtol=1e-4, atol=1e-4), (loss_m, ref_m)

    print("KERNEL_OK")
</pallas_src>

<mosaic_0001>
module attributes {stable_mosaic.version = 11 : i64} {
  func.func @kernel(%arg0: i32, %arg1: i32, %arg2: memref<8x128xf32, #tpu.memory_space<vmem>>, %arg3: memref<8x128xf32, #tpu.memory_space<vmem>>, %arg4: memref<8x128xf32, #tpu.memory_space<vmem>>, %arg5: memref<8x128xf32, #tpu.memory_space<vmem>>, %arg6: memref<2x128xf32, #tpu.memory_space<vmem>>, %arg7: memref<1x128xf32, #tpu.memory_space<vmem>>, %arg8: memref<1x128xf32, #tpu.memory_space<vmem>>) attributes {dimension_semantics = [#tpu.dimension_semantics<parallel>, #tpu.dimension_semantics<arbitrary>], iteration_bounds = array<i64: 2, 1>, scalar_prefetch = 0 : i64, scratch_operands = 2 : i64, tpu.core_type = #tpu.core_type<tc>, window_params = [{transform_indices = @transform_0, window_bounds = array<i64: 8, 128>}, {transform_indices = @transform_1, window_bounds = array<i64: 8, 128>}, {transform_indices = @transform_2, window_bounds = array<i64: 8, 128>}, {transform_indices = @transform_3, window_bounds = array<i64: 8, 128>}, {transform_indices = @transform_4, window_bounds = array<i64: 2, 128>}]} {
    %c0_i32 = arith.constant 0 : i32
    %0 = arith.cmpi eq, %arg1, %c0_i32 : i32
    %1 = arith.extui %0 : i1 to i32
    %c0_i32_0 = arith.constant 0 : i32
    %2 = arith.cmpi ne, %1, %c0_i32_0 : i32
    scf.if %2 {
      %cst_30 = arith.constant 0.000000e+00 : f32
      %72 = vector.broadcast %cst_30 : f32 to vector<1x128xf32>
      %c0_31 = arith.constant 0 : index
      %c0_32 = arith.constant 0 : index
      %73 = vector.load %arg7[%c0_31, %c0_32] : memref<1x128xf32, #tpu.memory_space<vmem>>, vector<1x128xf32>
      tpu.vector_store %arg7[%c0_31, %c0_32], %72 {strides = array<i32>} : memref<1x128xf32, #tpu.memory_space<vmem>>, vector<1x128xf32>,
      %cst_33 = arith.constant 0.000000e+00 : f32
      %74 = vector.broadcast %cst_33 : f32 to vector<1x128xf32>
      %c0_34 = arith.constant 0 : index
      %c0_35 = arith.constant 0 : index
      %75 = vector.load %arg8[%c0_34, %c0_35] : memref<1x128xf32, #tpu.memory_space<vmem>>, vector<1x128xf32>
      tpu.vector_store %arg8[%c0_34, %c0_35], %74 {strides = array<i32>} : memref<1x128xf32, #tpu.memory_space<vmem>>, vector<1x128xf32>,
    } else {
    }
    %c1_i32 = arith.constant 1 : i32
    %3 = arith.muli %arg0, %c1_i32 : i32
    %4 = arith.addi %3, %arg1 : i32
    %c0 = arith.constant 0 : index
    %c0_1 = arith.constant 0 : index
    %5 = vector.load %arg2[%c0, %c0_1] : memref<8x128xf32, #tpu.memory_space<vmem>>, vector<8x128xf32>
    %c0_2 = arith.constant 0 : index
    %c0_3 = arith.constant 0 : index
    %6 = vector.load %arg3[%c0_2, %c0_3] : memref<8x128xf32, #tpu.memory_space<vmem>>, vector<8x128xf32>
    %cst = arith.constant 0.000000e+00 : f32
    %7 = vector.broadcast %cst : f32 to vector<8x128xf32>
    %8 = arith.maximumf %5, %7 : vector<8x128xf32>
    %9 = arith.mulf %5, %6 : vector<8x128xf32>
    %10 = arith.subf %8, %9 : vector<8x128xf32>
    %11 = math.absf %5 : vector<8x128xf32>
    %cst_4 = arith.constant 0.000000e+00 : f32
    %12 = vector.broadcast %cst_4 : f32 to vector<8x128xf32>
    %13 = arith.subf %12, %11 : vector<8x128xf32>
    %14 = math.exp %13 : vector<8x128xf32>
    %15 = math.log1p %14 : vector<8x128xf32>
    %16 = arith.addf %10, %15 : vector<8x128xf32>
    %17 = tpu.iota {dimensions = array<i32: 0>} : vector<8x128xi32>
    %18 = tpu.iota {dimensions = array<i32: 1>} : vector<8x128xi32>
    %c8_i32 = arith.constant 8 : i32
    %19 = arith.muli %4, %c8_i32 : i32
    %20 = vector.broadcast %19 : i32 to vector<8x128xi32>
    %21 = arith.addi %20, %17 : vector<8x128xi32>
    %c128_i32 = arith.constant 128 : i32
    %22 = vector.broadcast %c128_i32 : i32 to vector<8x128xi32>
    %23 = arith.muli %21, %22 : vector<8x128xi32>
    %24 = arith.addi %23, %18 : vector<8x128xi32>
    %c64_i32 = arith.constant 64 : i32
    %25 = vector.broadcast %c64_i32 : i32 to vector<8x128xi32>
    %26 = arith.cmpi slt, %24, %25 : vector<8x128xi32>
    %cst_5 = arith.constant 0.000000e+00 : f32
    %27 = vector.broadcast %cst_5 : f32 to vector<8x128xf32>
    %28 = arith.select %26, %16, %27 : vector<8x128xi1>, vector<8x128xf32>
    %c0_6 = arith.constant 0 : index
    %c0_7 = arith.constant 0 : index
    %29 = vector.load %arg7[%c0_6, %c0_7] : memref<1x128xf32, #tpu.memory_space<vmem>>, vector<1x128xf32>
    %cst_8 = arith.constant dense<0.000000e+00> : vector<128xf32>
    %30 = vector.multi_reduction <add>, %28, %cst_8 [0] : vector<8x128xf32> to vector<128xf32>
    %31 = vector.shape_cast %30 : vector<128xf32> to vector<1x128xf32>
    %32 = arith.addf %29, %31 : vector<1x128xf32>
    %c0_9 = arith.constant 0 : index
    %c0_10 = arith.constant 0 : index
    %33 = vector.load %arg7[%c0_9, %c0_10] : memref<1x128xf32, #tpu.memory_space<vmem>>, vector<1x128xf32>
    tpu.vector_store %arg7[%c0_9, %c0_10], %32 {strides = array<i32>} : memref<1x128xf32, #tpu.memory_space<vmem>>, vector<1x128xf32>,
    %c0_11 = arith.constant 0 : index
    %c0_12 = arith.constant 0 : index
    %34 = vector.load %arg4[%c0_11, %c0_12] : memref<8x128xf32, #tpu.memory_space<vmem>>, vector<8x128xf32>
    %c0_13 = arith.constant 0 : index
    %c0_14 = arith.constant 0 : index
    %35 = vector.load %arg5[%c0_13, %c0_14] : memref<8x128xf32, #tpu.memory_space<vmem>>, vector<8x128xf32>
    %cst_15 = arith.constant 1.000000e-07 : f32
    %cst_16 = arith.constant 0.99999988 : f32
    %36 = vector.broadcast %cst_15 : f32 to vector<8x128xf32>
    %37 = arith.maximumf %36, %34 : vector<8x128xf32>
    %38 = vector.broadcast %cst_16 : f32 to vector<8x128xf32>
    %39 = arith.minimumf %38, %37 : vector<8x128xf32>
    %cst_17 = arith.constant 0.000000e+00 : f32
    %40 = vector.broadcast %cst_17 : f32 to vector<8x128xf32>
    %41 = arith.subf %40, %35 : vector<8x128xf32>
    %42 = math.log %39 : vector<8x128xf32>
    %43 = arith.mulf %35, %42 : vector<8x128xf32>
    %cst_18 = arith.constant 1.000000e+00 : f32
    %44 = vector.broadcast %cst_18 : f32 to vector<8x128xf32>
    %45 = arith.subf %44, %35 : vector<8x128xf32>
    %cst_19 = arith.constant 0.000000e+00 : f32
    %46 = vector.broadcast %cst_19 : f32 to vector<8x128xf32>
    %47 = arith.subf %46, %39 : vector<8x128xf32>
    %48 = math.log1p %47 : vector<8x128xf32>
    %49 = arith.mulf %45, %48 : vector<8x128xf32>
    %50 = arith.addf %43, %49 : vector<8x128xf32>
    %51 = arith.mulf %41, %50 : vector<8x128xf32>
    %52 = tpu.iota {dimensions = array<i32: 0>} : vector<8x128xi32>
    %53 = tpu.iota {dimensions = array<i32: 1>} : vector<8x128xi32>
    %c8_i32_20 = arith.constant 8 : i32
    %54 = arith.muli %4, %c8_i32_20 : i32
    %55 = vector.broadcast %54 : i32 to vector<8x128xi32>
    %56 = arith.addi %55, %52 : vector<8x128xi32>
    %c128_i32_21 = arith.constant 128 : i32
    %57 = vector.broadcast %c128_i32_21 : i32 to vector<8x128xi32>
    %58 = arith.muli %56, %57 : vector<8x128xi32>
    %59 = arith.addi %58, %53 : vector<8x128xi32>
    %c16_i32 = arith.constant 16 : i32
    %60 = vector.broadcast %c16_i32 : i32 to vector<8x128xi32>
    %61 = arith.cmpi slt, %59, %60 : vector<8x128xi32>
    %cst_22 = arith.constant 0.000000e+00 : f32
    %62 = vector.broadcast %cst_22 : f32 to vector<8x128xf32>
    %63 = arith.select %61, %51, %62 : vector<8x128xi1>, vector<8x128xf32>
    %c0_23 = arith.constant 0 : index
    %c0_24 = arith.constant 0 : index
    %64 = vector.load %arg8[%c0_23, %c0_24] : memref<1x128xf32, #tpu.memory_space<vmem>>, vector<1x128xf32>
    %cst_25 = arith.constant dense<0.000000e+00> : vector<128xf32>
    %65 = vector.multi_reduction <add>, %63, %cst_25 [0] : vector<8x128xf32> to vector<128xf32>
    %66 = vector.shape_cast %65 : vector<128xf32> to vector<1x128xf32>
    %67 = arith.addf %64, %66 : vector<1x128xf32>
    %c0_26 = arith.constant 0 : index
    %c0_27 = arith.constant 0 : index
    %68 = vector.load %arg8[%c0_26, %c0_27] : memref<1x128xf32, #tpu.memory_space<vmem>>, vector<1x128xf32>
    tpu.vector_store %arg8[%c0_26, %c0_27], %67 {strides = array<i32>} : memref<1x128xf32, #tpu.memory_space<vmem>>, vector<1x128xf32>,
    %c0_i32_28 = arith.constant 0 : i32
    %69 = arith.cmpi eq, %arg1, %c0_i32_28 : i32
    %70 = arith.extui %69 : i1 to i32
    %c0_i32_29 = arith.constant 0 : i32
    %71 = arith.cmpi ne, %70, %c0_i32_29 : i32
    scf.if %71 {
      %c0_30 = arith.constant 0 : index
      %c0_31 = arith.constant 0 : index
      %72 = vector.load %arg7[%c0_30, %c0_31] : memref<1x128xf32, #tpu.memory_space<vmem>>, vector<1x128xf32>
      %c0_32 = arith.constant 0 : index
      %c0_33 = arith.constant 0 : index
      %73 = vector.load %arg6[%c0_32, %c0_33] : memref<2x128xf32, #tpu.memory_space<vmem>>, vector<1x128xf32>
      tpu.vector_store %arg6[%c0_32, %c0_33], %72 {strides = array<i32>} : memref<2x128xf32, #tpu.memory_space<vmem>>, vector<1x128xf32>,
      %c0_34 = arith.constant 0 : index
      %c0_35 = arith.constant 0 : index
      %74 = vector.load %arg8[%c0_34, %c0_35] : memref<1x128xf32, #tpu.memory_space<vmem>>, vector<1x128xf32>
      %c1 = arith.constant 1 : index
      %c0_36 = arith.constant 0 : index
      %75 = vector.load %arg6[%c1, %c0_36] : memref<2x128xf32, #tpu.memory_space<vmem>>, vector<1x128xf32>
      tpu.vector_store %arg6[%c1, %c0_36], %74 {strides = array<i32>} : memref<2x128xf32, #tpu.memory_space<vmem>>, vector<1x128xf32>,
    } else {
    }
    return
  }
  func.func @transform_0(%arg0: i32, %arg1: i32) -> (i32, i32) {
    %c1_i32 = arith.constant 1 : i32
    %0 = arith.muli %arg0, %c1_i32 : i32
    %1 = arith.addi %0, %arg1 : i32
    %c0_i32 = arith.constant 0 : i32
    %c0_i32_0 = arith.constant 0 : i32
    return %1, %c0_i32 : i32, i32
  }
  func.func @transform_1(%arg0: i32, %arg1: i32) -> (i32, i32) {
    %c1_i32 = arith.constant 1 : i32
    %0 = arith.muli %arg0, %c1_i32 : i32
    %1 = arith.addi %0, %arg1 : i32
    %c0_i32 = arith.constant 0 : i32
    %c0_i32_0 = arith.constant 0 : i32
    return %1, %c0_i32 : i32, i32
  }
  func.func @transform_2(%arg0: i32, %arg1: i32) -> (i32, i32) {
    %c1_i32 = arith.constant 1 : i32
    %0 = arith.muli %arg0, %c1_i32 : i32
    %1 = arith.addi %0, %arg1 : i32
    %c0_i32 = arith.constant 0 : i32
    %c0_i32_0 = arith.constant 0 : i32
    return %1, %c0_i32 : i32, i32
  }
  func.func @transform_3(%arg0: i32, %arg1: i32) -> (i32, i32) {
    %c1_i32 = arith.constant 1 : i32
    %0 = arith.muli %arg0, %c1_i32 : i32
    %1 = arith.addi %0, %arg1 : i32
    %c0_i32 = arith.constant 0 : i32
    %c0_i32_0 = arith.constant 0 : i32
    return %1, %c0_i32 : i32, i32
  }
  func.func @transform_4(%arg0: i32, %arg1: i32) -> (i32, i32) {
    %c0_i32 = arith.constant 0 : i32
    %c0_i32_0 = arith.constant 0 : i32
    return %c0_i32, %arg0 : i32, i32
  }
}

</mosaic_0001>

<bundles_post_ra>
// kernel: tpu_custom_call.1
= control target key start
LH: loop header
LB: loop body
LE: loop exit
PB: predicated region body
PF: predicated region fallthrough
CT: control target
= control target key end

     0   :  { %s1247_s0 = inlined_call_operand.hbm [shape: f32[16,128], index: 0, kind: input, shape index: {}]   ;;  %s1248_s1 = inlined_call_operand.hbm [shape: f32[16,128], index: 1, kind: input, shape index: {}]   ;;  %s1249_s2 = inlined_call_operand.hbm [shape: f32[16,128], index: 2, kind: input, shape index: {}]   ;;  %s1250_s3 = inlined_call_operand.hbm [shape: f32[16,128], index: 3, kind: input, shape index: {}]   ;;  %s1251_s4 = inlined_call_operand.hbm [shape: f32[2,256], index: 4, kind: output, shape index: {}]  }
   0x1   :  { %1261 = sst [smem:[#allocation22_spill]] %s1248_s1 }
   0x2   :  { %9 = vsyncpa [#allocation5], 0 }
   0x3   :  { %11 = vsyncpa [#allocation5 + $0x1], 0 }
   0x4   :  { %12 = vsyncpa [#allocation8], 0 }
   0x5   :  { %14 = vsyncpa [#allocation8 + $0x1], 0 }
   0x6   :  { %15 = vsyncpa [#allocation11], 0 }
   0x7   :  { %17 = vsyncpa [#allocation11 + $0x1], 0 }
   0x8   :  { %18 = vsyncpa [#allocation6], 0 }
   0x9   :  { %20 = vsyncpa [#allocation6 + $0x1], 0  ;;  %s949_s15 = smov 0   ;;  %s951_s16 = smov 0  }
   0xa   :  { %s953_s17 = smov 0   ;;  %s955_s18 = smov 0  }
   0xb   :  { %s957_s19 = smov 0   ;;  %s959_s20 = smov 0  }
   0xc LB: > { %1262 = sst [smem:[#allocation17_spill]] %s904_s17  ;;  %s980_s21 = sadd.s32 4294967295, %s916_s20   ;;  %s916_s20 = sphi %s959_s20, %s26_s20   ;;  %s912_s19 = sphi %s957_s19, %s1288_s19   ;;  %s908_s18 = sphi %s955_s18, %s1287_s18   ;;  %s904_s17 = sphi %s953_s17, %s1286_s17   ;;  %s900_s16 = sphi %s951_s16, %s1290_s16   ;;  %s896_s15 = sphi %s949_s15, %s1289_s15  }
   0xd   : > { %1263 = sst [smem:[#allocation18_spill]] %s912_s19  ;;  %s598_s22 = sadd.s32 4294967294, %s916_s20  }
   0xe   : > { %1264 = sst [smem:[#allocation19_spill]] %s916_s20  ;;  %s38_s23 = sadd.s32 1, %s912_s19 }
   0xf   : > { %s47_s24 = sadd.s32 1, %s904_s17  ;;  %p40_p0 = scmp.ge.s32.totalorder %s38_s23, 2 }
  0x10   : > { %p54_p1 = scmp.ne.s32.totalorder %s904_s17, %s900_s16  ;;  %p55_p2 = scmp.eq.s32.totalorder %s916_s20, 0 }
  0x11   : > { %p60_p3 = scmp.ne.s32.totalorder %s900_s16, %s896_s15  ;;  %s1292_s23 = smov (%p40_p0, %s38_s23), 0 }
  0x12   : > { %1265 = sst [smem:[#allocation20_spill]] %s1292_s23  ;;  %p992_p4 = por %p55_p2, %p54_p1 }
  0x13   : > { %p61_p5 = scmp.eq.s32.totalorder %s980_s21, 0  ;;  %s44_s26 = ssub.s32 %s912_s19, %s1292_s23 }
  0x14   : > { %p168_p6 = scmp.eq.s32.totalorder %s980_s21, 1  ;;  %p45_p7 = scmp.eq.s32.totalorder %s44_s26, 0 }
  0x15   : > { %p1000_p8 = por %p61_p5, %p60_p3  ;;  %p174_p10 = scmp.eq.s32.totalorder %s598_s22, 1 }
  0x16   : > { %p1004_p9 = por %p168_p6, %p54_p1  ;;  %p647_p13 = scmp.lt.s32.totalorder %s916_s20, 2 }
  0x17   : > { %s1267_s27 = scalar_select %p1000_p8, 1, 0 }
  0x18   : > { %s1268_s28 = scalar_select %p1004_p9, 1, 0 }
  0x19   : > { %s1009_s29 = scalar_select %p45_p7, %s904_s17, %s47_s24  }
  0x1a   : > { %p1011_p11 = por %p174_p10, %p60_p3  ;;  %s1018_s5 = sand.u32 1, %s904_s17  }
  0x1b   : > { %1269 = sst [smem:[#allocation21_spill]] %s1009_s29  ;;  %s1021_s6 = sshll.u32 %s1018_s5, 3 }
  0x1c   : > { %s1270_s30 = scalar_select %p1011_p11, 1, 0 }
  0x1d   : > { %s1024_s7 = sshll.u32 %s912_s19, 7  ;;  %p1028_p0 = pnand %p647_p13, %p992_p4 }
  0x1e   : > { %s213_s9 = sand.u32 1, %s916_s20   ;;  %s1272_s1 = sld [smem:[#allocation22_spill]] }
  0x1f   : > { %s1271_s8 = scalar_select %p1028_p0, 1, 0 }
  0x20   : > { %s217_s13 = scalar_lea.vmem [#allocation7], %s1021_s6  ;;  %s1044_s22 = scalar_lea.sflag [#allocation8], %s213_s9 }
  0x21   : > { %s225_s14 = sshll.u32 %s217_s13, 4  ;;  %p1050_p4 = pneg %p1028_p0  ;;  %s1041_s14 = int_to_ptr.vmem [resolvable:$true] %s225_s14 }
  0x24   : > { %s1037_s12 = scalar_lea.hbm %s1272_s1, %s1024_s7  ;;  %s711_s11 = scalar_lea.hbm %s1272_s1, 256 }
  0x25   : > { %s706_s24 = scalar_lea.hbm %s1037_s12, 128  ;;  %p712_p7 = scmp.lt.u32.totalorder %s1037_s12, %s1272_s1 }
  0x26   : > { %p707_p3 = scmp.ne.s32.totalorder %s1037_s12, %s706_s24  ;;  %p713_p10 = scmp.lt.u32.totalorder %s711_s11, %s706_s24 }
  0x27   : > { %p715_p12 = scmp.lt.u32.totalorder %s706_s24, %s1037_s12 }
  0x28   : > { %p709_p5 = pnand %p1050_p4, %p707_p3  ;;  %p714_p13 = por %p713_p10, %p712_p7 }
  0x2a   : > { %p710_p6 = pneg %p709_p5  ;;  %p716_p1 = por %p715_p12, %p714_p13 }
  0x2c   : > { %p717_p2 = pnand %p716_p1, %p710_p6 }
  0x2e   : > { %720 = shalt.err (!%p717_p2)
}
  0x2f   : > { %s721_s9 = scalar_lea.vmem %s1041_s14, 128  ;;  %s918_s26 = smov [#allocation7]  }
  0x30   : > { %p722_p3 = scmp.ne.s32.totalorder %s1041_s14, %s721_s9  ;;  %s726_s10 = sshll.u32 %s918_s26, 4  ;;  %s727_s10 = int_to_ptr.vmem [resolvable:$false] %s726_s10 }
  0x31   : > { %s728_s23 = scalar_lea.vmem %s727_s10, 256  ;;  %p729_p9 = scmp.lt.s32.totalorder %s1041_s14, %s727_s10 }
  0x32   : > { %p724_p5 = pnand %p722_p3, %p1050_p4  ;;  %p730_p8 = scmp.lt.s32.totalorder %s728_s23, %s721_s9 }
  0x34   : > { %p725_p11 = pneg %p724_p5  ;;  %p731_p7 = por %p730_p8, %p729_p9 }
  0x36   : > { %p732_p10 = pnand %p731_p7, %p725_p11 }
  0x38   : > { %735 = shalt.err (!%p732_p10)
}
  0x39   : > { %636 = dma.hbm_to_vmem [thread:$0]  (!%p1028_p0), %s1037_s12, 128, %s1041_s14, %s1044_s22  }
  0x3a   : > { %p1274_p12 = scmp.lt.s32.totalorder %s916_s20, 3  ;;  %p1275_p1 = scmp.ge.s32.totalorder %s916_s20, 1 }
  0x3b   : > { %s1086_s9 = scalar_lea.hbm %s1247_s0, %s1024_s7  ;;  %s198_s26 = scalar_lea.vmem [#allocation4], %s1021_s6 }
  0x3c   : > { %p1078_p2 = pnand %p1275_p1, %p1274_p12  ;;  %s206_s10 = sshll.u32 %s198_s26, 4  ;;  %s1089_s10 = int_to_ptr.vmem [resolvable:$true] %s206_s10 }
  0x3d   : > { %s1095_s23 = scalar_lea.hbm %s1249_s2, %s1024_s7  ;;  %s195_s1 = scalar_lea.sflag [#allocation5], %s1018_s5 }
  0x3e   : > { %s1276_s24 = scalar_select %p1078_p2, 1, 0 }
  0x3f   : > { %s736_s19 = scalar_lea.hbm %s1086_s9, 128  ;;  %s741_s29 = scalar_lea.hbm %s1247_s0, 256 }
  0x40   : > { %p737_p8 = scmp.ne.s32.totalorder %s1086_s9, %s736_s19  ;;  %p742_p6 = scmp.lt.u32.totalorder %s1086_s9, %s1247_s0 }
  0x41   : > { %p743_p13 = scmp.lt.u32.totalorder %s741_s29, %s736_s19  ;;  %p745_p5 = scmp.lt.u32.totalorder %s736_s19, %s1086_s9 }
  0x42   : > { %p739_p9 = pnand %p737_p8, %p1050_p4 }
  0x43   : > { %p744_p3 = por %p743_p13, %p742_p6 }
  0x44   : > { %p740_p11 = pneg %p739_p9 }
  0x45   : > { %p746_p7 = por %p745_p5, %p744_p3 }
  0x47   : > { %p747_p10 = pnand %p746_p7, %p740_p11 }
  0x49   : > { %750 = shalt.err (!%p747_p10)
}
  0x4a   : > { %s751_s26 = scalar_lea.vmem %s1089_s10, 128  ;;  %s919_s12 = smov [#allocation4]  }
  0x4b   : > { %p752_p12 = scmp.ne.s32.totalorder %s1089_s10, %s751_s26  ;;  %s756_s14 = sshll.u32 %s919_s12, 4  ;;  %s757_s14 = int_to_ptr.vmem [resolvable:$false] %s756_s14 }
  0x4c   : > { %s758_s17 = scalar_lea.vmem %s757_s14, 256  ;;  %p759_p9 = scmp.lt.s32.totalorder %s1089_s10, %s757_s14 }
  0x4d   : > { %p754_p1 = pnand %p752_p12, %p1050_p4  ;;  %p760_p2 = scmp.lt.s32.totalorder %s758_s17, %s751_s26 }
  0x4f   : > { %p755_p8 = pneg %p754_p1  ;;  %p761_p6 = por %p760_p2, %p759_p9 }
  0x51   : > { %p762_p13 = pnand %p761_p6, %p755_p8 }
  0x53   : > { %765 = shalt.err (!%p762_p13)
}
  0x54   : > { %633 = dma.hbm_to_vmem [thread:$0]  (!%p1028_p0), %s1086_s9, 128, %s1089_s10, %s195_s1  }
  0x55   : > { %s236_s19 = scalar_lea.vmem [#allocation9], %s1021_s6  ;;  %s766_s29 = scalar_lea.hbm %s1095_s23, 128 }
  0x56   : > { %s244_s20 = sshll.u32 %s236_s19, 4  ;;  %p767_p11 = scmp.ne.s32.totalorder %s1095_s23, %s766_s29  ;;  %s245_s20 = int_to_ptr.vmem [resolvable:$true] %s244_s20 }
  0x57   : > { %s771_s26 = scalar_lea.hbm %s1249_s2, 256  ;;  %p772_p5 = scmp.lt.u32.totalorder %s1095_s23, %s1249_s2 }
  0x58   : > { %p769_p2 = pnand %p767_p11, %p1050_p4  ;;  %p773_p7 = scmp.lt.u32.totalorder %s771_s26, %s766_s29 }
  0x59   : > { %p775_p12 = scmp.lt.u32.totalorder %s766_s29, %s1095_s23 }
  0x5a   : > { %p770_p3 = pneg %p769_p2  ;;  %p774_p10 = por %p773_p7, %p772_p5 }
  0x5c   : > { %p776_p1 = por %p775_p12, %p774_p10 }
  0x5e   : > { %p777_p8 = pnand %p776_p1, %p770_p3 }
  0x60   : > { %780 = shalt.err (!%p777_p8)
}
  0x61   : > { %s781_s1 = scalar_lea.vmem %s245_s20, 128  ;;  %s920_s9 = smov [#allocation9]  }
  0x62   : > { %p782_p9 = scmp.ne.s32.totalorder %s245_s20, %s781_s1  ;;  %s786_s10 = sshll.u32 %s920_s9, 4  ;;  %s787_s10 = int_to_ptr.vmem [resolvable:$false] %s786_s10 }
  0x63   : > { %s788_s17 = scalar_lea.vmem %s787_s10, 256  ;;  %p789_p11 = scmp.lt.s32.totalorder %s245_s20, %s787_s10 }
  0x64   : > { %p784_p6 = pnand %p782_p9, %p1050_p4  ;;  %p790_p2 = scmp.lt.s32.totalorder %s788_s17, %s781_s1 }
  0x66   : > { %p785_p13 = pneg %p784_p6  ;;  %p791_p0 = por %p790_p2, %p789_p11 }
  0x68   : > { %p792_p5 = pnand %p791_p0, %p785_p13 }
  0x6a   : > { %795 = shalt.err (!%p792_p5)
}
  0x6b   : > { %p1277_p7 = scmp.ne.s32.totalorder %s1271_s8, 0  ;;  %s1142_s11 = scalar_lea.hbm %s1250_s3, %s1024_s7 }
  0x6c   : > { %s255_s13 = scalar_lea.vmem [#allocation10], %s1021_s6  ;;  %s252_s12 = scalar_lea.sflag [#allocation11], %s1018_s5 }
  0x6d   : > { %639 = dma.hbm_to_vmem [thread:$0]  (!%p1277_p7), %s1095_s23, 128, %s245_s20, %s1044_s22  }
  0x6e   : > { %s263_s26 = sshll.u32 %s255_s13, 4  ;;  %s796_s14 = scalar_lea.hbm %s1142_s11, 128  ;;  %s264_s26 = int_to_ptr.vmem [resolvable:$true] %s263_s26 }
  0x6f   : > { %p797_p0 = scmp.ne.s32.totalorder %s1142_s11, %s796_s14  ;;  %s801_s23 = scalar_lea.hbm %s1250_s3, 256 }
  0x70   : > { %p802_p12 = scmp.lt.u32.totalorder %s1142_s11, %s1250_s3  ;;  %p803_p1 = scmp.lt.u32.totalorder %s801_s23, %s796_s14 }
  0x71   : > { %p799_p3 = pnand %p797_p0, %p1050_p4  ;;  %p805_p9 = scmp.lt.u32.totalorder %s796_s14, %s1142_s11 }
  0x72   : > { %p804_p8 = por %p803_p1, %p802_p12 }
  0x73   : > { %p800_p10 = pneg %p799_p3 }
  0x74   : > { %p806_p6 = por %p805_p9, %p804_p8 }
  0x76   : > { %p807_p13 = pnand %p806_p6, %p800_p10 }
  0x78   : > { %810 = shalt.err (!%p807_p13)
}
  0x79   : > { %s811_s5 = scalar_lea.vmem %s264_s26, 128  ;;  %s921_s6 = smov [#allocation10]  }
  0x7a   : > { %p812_p11 = scmp.ne.s32.totalorder %s264_s26, %s811_s5  ;;  %s816_s9 = sshll.u32 %s921_s6, 4  ;;  %s817_s9 = int_to_ptr.vmem [resolvable:$false] %s816_s9 }
  0x7b   : > { %s818_s10 = scalar_lea.vmem %s817_s9, 256  ;;  %p819_p0 = scmp.lt.s32.totalorder %s264_s26, %s817_s9 }
  0x7c   : > { %p814_p2 = pnand %p812_p11, %p1050_p4  ;;  %p820_p3 = scmp.lt.s32.totalorder %s818_s10, %s811_s5 }
  0x7e   : > { %p815_p5 = pneg %p814_p2  ;;  %p821_p7 = por %p820_p3, %p819_p0 }
  0x80   : > { %p822_p1 = pnand %p821_p7, %p815_p5 }
  0x82   : > { %825 = shalt.err (!%p822_p1)
}
  0x83   : > { %p1278_p12 = scmp.ne.s32.totalorder %s1271_s8, 0  ;;  %p1279_p10 = scmp.ne.s32.totalorder %s1276_s24, 0 }
  0x84   : > { %s1166_s25 = sand.u32 (!%p1279_p10), 1, %s900_s16   ;;  %p1280_p4 = scmp.ne.s32.totalorder (!%p1279_p10), %s1267_s27, 0 }
  0x85   : > { %642 = dma.hbm_to_vmem [thread:$0]  (!%p1278_p12), %s1142_s11, 128, %s264_s26, %s252_s12  }
  0x86   : > { %272 = sbr.rel (%p1279_p10) target bundleno = 222 (0xde), region = 36  ;;  %s1169_s17 = sshll.u32 (!%p1279_p10), %s1166_s25, 3 }
  0x87   : > { %s275_s19 = scalar_lea.sflag (!%p1279_p10), [#allocation5], %s1166_s25  ;;  %s278_s29 = scalar_lea.vmem (!%p1279_p10), [#allocation4], %s1169_s17 }
  0x8d   : > { %879 = dma.done.wait (%p1280_p4), %s275_s19, 128  }
  0x8e   : > { %881 = vsyncadd (%p1280_p4), %s275_s19, 4294967168  ;;  %s283_s8 = sand.u32 1, %s980_s21   ;;  %s287_s11 = scalar_lea.vmem [#allocation7], %s1169_s17 }
  0x8f   : > { %s284_s24 = scalar_lea.sflag [#allocation8], %s283_s8 }
  0x90   : > { %883 = dma.done.wait (%p1280_p4), %s284_s24, 256  }
  0x91   : > { %885 = vsyncadd (%p1280_p4), %s284_s24, 4294967040  ;;  %s296_s13 = scalar_lea.vmem [#allocation9], %s1169_s17  ;;  %s302_s26 = scalar_lea.sflag [#allocation11], %s1166_s25 }
  0x92   : > { %s305_s12 = scalar_lea.vmem [#allocation10], %s1169_s17 }
  0x93   : > { %887 = dma.done.wait (%p1280_p4), %s302_s26, 128  }
  0x94   : > { %889 = vsyncadd (%p1280_p4), %s302_s26, 4294967168  ;;  %v922_v0 = vmov 0.0   ;;  %v356_v1 = vld [vmem:[%s278_s29] sm:$0xff]  ;;  %v375_v9 = vlaneseq  ;;  %s615_s21 = sshll.u32 %s908_s18, 3  ;;  %v396_v19 = vld [vmem:[%s305_s12] sm:$0xff]  ;;  %s614_s27 = sshll.u32 %s1166_s25, 1 }
  0x95   : > { %353 = vst [vmem:[#allocation2] sm:$0x1] %v922_v0  ;;  %354 = vst [vmem:[#allocation3] sm:$0x1] %v922_v0  ;;  %v395_v2 = vld [vmem:[%s296_s13] sm:$0xff]  ;;  %v380_v13 = vstv %s615_s21  ;;  %v403_v26 = vsub.f32 1.0, %v396_v19 }
  0x96   : > { %v361_v3 = vand.u32 2147483647, %v356_v1  ;;  %v397_v4 = vmax.f32 %v395_v2, 1e-07  ;;  %v376_v11 = vshrl.u32 %v375_v9, 7  ;;  %v378_v22 = vand.u32 127, %v375_v9 }
  0x97   : > { %v357_v30 = vld [vmem:[%s287_s11] sm:$0xff]  ;;  %v399_v33 = vsub.f32 0.0, %v396_v19  ;;  %v358_v36 = vmax.f32 %v356_v1, 0.0  ;;  %s344_s14 = scalar_lea.vmem [#allocation12], %s614_s27  ;;  %s617_s22 = sshll.u32 %s908_s18, 5 }
  0x98   : > { %v362_v5 = vsub.f32 0.0, %v361_v3  ;;  %v398_v6 = vmin.f32 %v397_v4, 0.9999999  ;;  %v381_v14 = vadd.s32 %v380_v13, %v376_v11  ;;  %v359_v37 = vmul.f32 %v357_v30, %v356_v1  ;;  %s449_s1 = sshll.u32 %s344_s14, 4  ;;  %s1200_s7 = scalar_lea.hbm %s1251_s4, %s617_s22  ;;  %s1195_s1 = int_to_ptr.vmem [resolvable:$true] %s449_s1 }
  0x99   : > { %s436_s5 = scalar_lea.sflag [#allocation6], %s1166_s25  ;;  %s826_s6 = scalar_lea.vmem %s1195_s1, 32 }
  0x9a   : > { %v363_v7 = vmul.f32 1.442695, %v362_v5  ;;  %698 = vlog2.f32 %v398_v6  ;;  %v404_v8 = vsub.f32 0.0, %v398_v6  ;;  %v382_v23 = vmul.u32 128, %v381_v14  ;;  %p827_p7 = scmp.ne.s32.totalorder %s1195_s1, %s826_s6  ;;  %p1281_p8 = scmp.ne.s32.totalorder %s1268_s28, 0 }
  0x9b   : > { %v360_v43 = vsub.f32 %v358_v36, %v359_v37  ;;  %s923_s9 = smov [#allocation12]  }
  0x9c   : > { %700 = vpow2.f32 %v363_v7  ;;  %v405_v10 = vadd.f32 1.0, %v404_v8  ;;  %v408_v12 = vmul.f32 -0.5, %v404_v8  ;;  %v411_v17 = vand.u32 2147483647, %v404_v8  ;;  %v419_v56 = vld [vmem:[#allocation3] sm:$0x1]  ;;  %p828_p9 = pnand %p827_p7, %p1281_p8 }
  0x9d   : > { %v383_v31 = vadd.s32 %v382_v23, %v378_v22  ;;  %v386_v62 = vld [vmem:[#allocation2] sm:$0x1]  ;;  %s830_s18 = sshll.u32 %s923_s9, 4  ;;  %s831_s18 = int_to_ptr.vmem [resolvable:$false] %s830_s18 }
  0x9e   : > { %702 = vlog2.f32 %v405_v10  ;;  %v409_v15 = vadd.f32 1.0, %v408_v12  ;;  %vm412_vm0 = vcmp.lt.f32.partialorder %v411_v17, 0.0004427343  ;;  %p829_p6 = pneg %p828_p9  ;;  %s832_s10 = scalar_lea.vmem %s831_s18, 64 }
  0x9f   : > { %vm417_vm1 = vcmp.lt.s32.totalorder %v383_v31, 16  ;;  %vm384_vm3 = vcmp.lt.s32.totalorder %v383_v31, 64  ;;  %p833_p13 = scmp.lt.s32.totalorder %s1195_s1, %s831_s18  ;;  %p834_p11 = scmp.lt.s32.totalorder %s832_s10, %s826_s6 }
  0xa0   : > { %v410_v24 = vmul.f32 %v409_v15, %v404_v8 }
  0xa1   : > { %p835_p2 = por %p834_p11, %p833_p13 }
  0xa3   : > { %p836_p5 = pnand %p835_p2, %p829_p6 }
  0xa4   : > { %v699_v16 = vpop.eup %698 }
  0xa5   : > { %v401_v21 = vmul.f32 0.6931472, %v699_v16 }
  0xa6   : > { %v701_v18 = vpop.eup %700 }
  0xa7   : > { %v365_v20 = vadd.f32 1.0, %v701_v18  ;;  %v368_v27 = vmul.f32 -0.5, %v701_v18  ;;  %v402_v29 = vmul.f32 %v401_v21, %v396_v19  ;;  %v371_v38 = vand.u32 2147483647, %v701_v18 }
  0xa8   : > { %v703_v25 = vpop.eup %702 }
  0xa9   : > { %704 = vlog2.f32 %v365_v20  ;;  %v407_v28 = vmul.f32 0.6931472, %v703_v25  ;;  %v369_v35 = vadd.f32 1.0, %v368_v27  ;;  %vm372_vm2 = vcmp.lt.f32.partialorder %v371_v38, 0.0004427343 }
  0xab   : > { %v413_v32 = vsel %vm412_vm0, %v410_v24, %v407_v28  ;;  %v370_v41 = vmul.f32 %v701_v18, %v369_v35 }
  0xac   : > { %v414_v34 = vmul.f32 %v413_v32, %v403_v26 }
  0xae   : > { %v415_v39 = vadd.f32 %v414_v34, %v402_v29 }
  0xb0   : > { %v416_v40 = vmul.f32 %v415_v39, %v399_v33 }
  0xb2   : > { %v418_v44 = vsel %vm417_vm1, %v416_v40, 0.0 }
  0xb3   : > { %v705_v42 = vpop.eup %704  ;;  %v420_v46 = vrot.slane %v418_v44, 4 }
  0xb4   : > { %v367_v45 = vmul.f32 0.6931472, %v705_v42 }
  0xb5   : > { %v421_v48 = vadd.f32 %v420_v46, %v418_v44 }
  0xb6   : > { %v373_v47 = vsel %vm372_vm2, %v370_v41, %v367_v45 }
  0xb7   : > { %v374_v49 = vadd.f32 %v373_v47, %v360_v43  ;;  %v422_v50 = vrot.slane %v421_v48, 2 }
  0xb9   : > { %v385_v51 = vsel %vm384_vm3, %v374_v49, 0.0  ;;  %v423_v53 = vadd.f32 %v422_v50, %v421_v48 }
  0xba   : > { %v387_v52 = vrot.slane %v385_v51, 4 }
  0xbb   : > { %v424_v55 = vrot.slane %v423_v53, 1 }
  0xbc   : > { %v388_v54 = vadd.f32 %v387_v52, %v385_v51 }
  0xbd   : > { %v425_v58 = vadd.f32 %v424_v55, %v423_v53 }
  0xbe   : > { %v389_v57 = vrot.slane %v388_v54, 2 }
  0xbf   : > { %v426_v60 = vadd.f32 %v425_v58, %v419_v56 }
  0xc0   : > { %v390_v59 = vadd.f32 %v389_v57, %v388_v54 }
  0xc1   : > { %427 = vst [vmem:[#allocation3] sm:$0x1] %v426_v60 }
  0xc2   : > { %v391_v61 = vrot.slane %v390_v59, 1 }
  0xc4   : > { %v392_v63 = vadd.f32 %v391_v61, %v390_v59 }
  0xc6   : > { %v393_v0 = vadd.f32 %v392_v63, %v386_v62 }
  0xc8   : > { %394 = vst [vmem:[#allocation2] sm:$0x1] %v393_v0  ;;  %v433_v1 = vld [vmem:[#allocation3] sm:$0x1] }
  0xc9   : > { %434 = vst [vmem:[%s344_s14 + $0x1] sm:$0x1] %v433_v1 }
  0xcf   : > { %v431_v2 = vld [vmem:[#allocation2] sm:$0x1] }
  0xd0   : > { %432 = vst [vmem:[%s344_s14] sm:$0x1] %v431_v2 }
  0xd1   : > { %839 = shalt.err (!%p836_p5)
}
  0xd2   : > { %s840_s25 = scalar_lea.hbm %s1200_s7, 32  ;;  %s844_s29 = scalar_lea.hbm %s1251_s4, 64 }
  0xd3   : > { %p841_p0 = scmp.ne.s32.totalorder %s1200_s7, %s840_s25  ;;  %p845_p12 = scmp.lt.u32.totalorder %s1200_s7, %s1251_s4 }
  0xd4   : > { %p846_p10 = scmp.lt.u32.totalorder %s844_s29, %s840_s25  ;;  %p848_p7 = scmp.lt.u32.totalorder %s840_s25, %s1200_s7 }
  0xd5   : > { %p842_p3 = pnand %p841_p0, %p1281_p8 }
  0xd6   : > { %p847_p4 = por %p846_p10, %p845_p12 }
  0xd7   : > { %p843_p1 = pneg %p842_p3 }
  0xd8   : > { %p849_p9 = por %p848_p7, %p847_p4 }
  0xda   : > { %p850_p6 = pnand %p849_p9, %p843_p1 }
  0xdc   : > { %853 = shalt.err (!%p850_p6)
}
  0xdd   : > { %628 = dma.vmem_to_hbm [thread:$0]  (%p1281_p8), %s1195_s1, 32, %s1200_s7, %s436_s5  }
  0xde PF: > { %s1282_s11 = sld [smem:[#allocation19_spill]]  ;;  %s461_s13 = sand.u32 1, %s896_s15  }
  0xdf   : > { %p1283_p13 = scmp.ne.s32.totalorder %s1270_s30, 0  ;;  %s462_s26 = scalar_lea.sflag [#allocation6], %s461_s13 }
  0xe4   : > { %p1284_p11 = scmp.ge.s32.totalorder %s1282_s11, 2 }
  0xe6   : > { %p644_p2 = pnand %p1284_p11, %p1283_p13 }
  0xe8   : > { %891 = dma.done.wait (!%p644_p2), %s462_s26, 32  }
  0xe9   : > { %893 = vsyncadd (!%p644_p2), %s462_s26, 4294967264  ;;  %s26_s20 = sadd.s32 1, %s1282_s11   ;;  %s1285_s12 = sld [smem:[#allocation17_spill]] }
  0xea   : > { %p23_p5 = scmp.ge.s32.totalorder %s26_s20, 4   ;;  %s1286_s17 = sld [smem:[#allocation21_spill]] }
  0xeb   : > { %s1287_s18 = sld [smem:[#allocation18_spill]]  ;;  %s1288_s19 = sld [smem:[#allocation20_spill]] }
  0xec   : > { %s1289_s15 = smov %s900_s16  ;;  %25 = sbr.rel (!%p23_p5) target bundleno = 12 (0xc), region = 126 }
  0xef   : > { %s1290_s16 = smov %s1285_s12 }
  0xf3   :  { %467 = vsyncpa [#allocation5], 1 }
  0xf4   :  { %469 = vsyncpa [#allocation5 + $0x1], 1 }
  0xf5   :  { %470 = vsyncpa [#allocation8], 1 }
  0xf6   :  { %472 = vsyncpa [#allocation8 + $0x1], 1 }
  0xf7   :  { %473 = vsyncpa [#allocation11], 1 }
  0xf8   :  { %475 = vsyncpa [#allocation11 + $0x1], 1 }
  0xf9   :  { %476 = vsyncpa [#allocation6], 1 }
  0xfa   :  { %478 = vsyncpa [#allocation6 + $0x1], 1 }

</bundles_post_ra>
